<compile_context>
chip_gen: v7x
topology: tpu7x:2x2x1
jax: 0.10.0
libtpu: 0.0.40
codegen_flags: <defaults>
</compile_context>

<pallas_src>
import numpy as np
import jax
import jax.numpy as jnp
from jax.experimental import pallas as pl
from jax.experimental.pallas import tpu as pltpu

_LANE = 128
_MIB = 1024 * 1024


def _pixelate_kernel(r_ref, c_ref, x_ref, o_ref):
    # r_ref : (h, h)    composed row-gather selector (one-hot rows)
    # c_ref : (Wl, Wl)  composed (block-diagonal) column-gather selector
    # x_ref : (p, h, Wl) block of (lane-folded) image planes
    p, h, wl = x_ref.shape
    cdt = x_ref.dtype  # compute dtype == input dtype (bf16 stays native bf16)

    # Column (lane-axis) gather: ONE big lane-dense matmul over the whole block.
    t = jnp.dot(x_ref[...].reshape(p * h, wl), c_ref[...],
                preferred_element_type=cdt)                    # (p*h, Wl)

    # Row (sublane-axis) gather: ONE batched matmul over the plane axis.
    # Selectors are strictly one-hot (a single product per output element), so
    # accumulating in the input dtype — including bf16 — is exact.
    rb = jnp.broadcast_to(r_ref[...][None], (p, h, h))
    y = jnp.einsum("phk,pkw->phw", rb, t.reshape(p, h, wl),
                   preferred_element_type=cdt)                 # (p, h, Wl)

    # Single whole-block, lane-dense store.
    o_ref[...] = y.astype(o_ref.dtype)


def _divisors_upto(n, hi):
    hi = max(1, min(n, hi))
    return [d for d in range(1, hi + 1) if n % d == 0]


def _vmem_budget_bytes():
    cap = 64 * _MIB  # conservative default (v7x per-TensorCore VMEM)
    try:
        cap = int(pltpu.get_tpu_info().vmem_capacity_bytes)
        if "v7" in jax.devices()[0].device_kind.lower():
            cap = min(cap, 64 * _MIB)
    except Exception:
        cap = 64 * _MIB
    return min((cap * 3) // 4, 96 * _MIB)


def _dual_tensorcore():
    try:
        kind = jax.devices()[0].device_kind.lower()
        return any(t in kind for t in ("v7", "v4", "v5p", "v5 p"))
    except Exception:
        return False


def pixelate(x, scale=4):
    """JAX/Pallas equivalent of Pixelate(scale)(x). x: (N, C, H, W) or (C, H, W)."""
    if x.ndim < 4:
        x = x[None]  # PyTorch module unsqueezes and returns 4D
    n, c, h, w = x.shape
    orig_dtype = x.dtype
    if not jnp.issubdtype(orig_dtype, jnp.floating):
        # TODO(synk): integer-preserving gather path for |v| > 2**24 int inputs.
        x = x.astype(jnp.float32)
    cdt = x.dtype
    itemsize = jnp.dtype(cdt).itemsize
    nc = n * c

    # ---- composed nearest-neighbour selectors (PyTorch index arithmetic,
    # downscale then upscale), built host-side -------------------------------
    dh = max(h // scale, 1)
    dw = max(w // scale, 1)
    r_src = (((np.arange(h) * dh) // h) * h) // dh   # output row -> source row
    c_src = (((np.arange(w) * dw) // w) * w) // dw   # output col -> source col
    r_sel = np.zeros((h, h), np.float32)
    r_sel[np.arange(h), r_src] = 1.0                 # (R @ X)[i, :]  = X[r_src[i], :]
    c_sel = np.zeros((w, w), np.float32)
    c_sel[c_src, np.arange(w)] = 1.0                 # (X @ C)[:, j]  = X[:, c_src[j]]

    # ---- lane folding: pack g planes side by side along the lane axis so the
    # output last dim is >= 128 lanes (lane-dense vregs and stores) ----------
    g = 1
    if w < _LANE and nc > 1:
        for d in _divisors_upto(nc, max(1, (4 * _LANE) // w)):
            g = d                                    # largest divisor, g*w <= 512
    wl = g * w
    m = nc // g
    if g > 1:
        xf = x.reshape(m, g, h, w).transpose(0, 2, 1, 3).reshape(m, h, wl)
        c_sel = np.kron(np.eye(g, dtype=np.float32), c_sel)   # block-diagonal
    else:
        xf = x.reshape(m, h, wl)
    r_dev = jnp.asarray(r_sel, cdt)
    c_dev = jnp.asarray(c_sel, cdt)

    # ---- block sizing (generation-aware) ------------------------------------
    vmem_limit = _vmem_budget_bytes()
    plane_bytes = h * wl * itemsize
    sel_bytes = int(r_sel.size + c_sel.size) * itemsize
    # Roughly 8x a block lives in VMEM at once (2x double-buffered input,
    # 2x double-buffered output, in-kernel temporaries) plus the selectors.
    block_target = max(2 * _MIB, (vmem_limit - 2 * sel_bytes) // 8)

    p = 1
    for d in _divisors_upto(m, 512):
        if d > 1 and d * plane_bytes > block_target:
            continue
        if d > 1 and d * h * h * itemsize > 2 * _MIB:   # keep broadcast R small
            continue
        p = d

    # Dual-TensorCore parts: prefer an even grid length so both cores get the
    # same number of "parallel" steps (no-op on single-TC v5e/v6e).
    if _dual_tensorcore() and (m // p) > 1 and (m // p) % 2 == 1 and p % 2 == 0:
        p //= 2

    grid = (m // p,)

    cost = pl.CostEstimate(
        flops=int(2 * m * h * wl * (wl + h)),
        transcendentals=0,
        # selectors are grid-invariant: count them once, not per grid step
        bytes_accessed=int(2 * m * h * wl * itemsize + sel_bytes),
    )

    out = pl.pallas_call(
        _pixelate_kernel,
        out_shape=jax.ShapeDtypeStruct((m, h, wl), cdt),
        grid_spec=pltpu.PrefetchScalarGridSpec(
            num_scalar_prefetch=0,
            grid=grid,
            in_specs=[
                pl.BlockSpec((h, h), lambda i: (0, 0)),       # R   (grid-invariant)
                pl.BlockSpec((wl, wl), lambda i: (0, 0)),     # C   (grid-invariant)
                pl.BlockSpec((p, h, wl), lambda i: (i, 0, 0)),  # plane block
            ],
            out_specs=pl.BlockSpec((p, h, wl), lambda i: (i, 0, 0)),
        ),
        compiler_params=pltpu.CompilerParams(
            dimension_semantics=("parallel",),
            vmem_limit_bytes=int(vmem_limit),
        ),
        cost_estimate=cost,
    )(r_dev, c_dev, xf)

    # ---- undo lane folding ---------------------------------------------------
    if g > 1:
        out = out.reshape(m, h, g, w).transpose(0, 2, 1, 3).reshape(n, c, h, w)
    else:
        out = out.reshape(n, c, h, w)
    if out.dtype != orig_dtype:
        out = out.astype(orig_dtype)
    return out


def _pixelate_ref(x, scale=4):
    """Pure-numpy reference with identical nearest-neighbor semantics."""
    if x.ndim < 4:
        x = x[None]
    _, _, h, w = x.shape
    dh = max(h // scale, 1)
    dw = max(w // scale, 1)
    ri = (((np.arange(h) * dh) // h) * h) // dh
    cj = (((np.arange(w) * dw) // w) * w) // dw
    return x[:, :, ri, :][:, :, :, cj]


if __name__ == "__main__":
    key = jax.random.PRNGKey(0)
    x = jax.random.normal(key, (2, 4, 16, 16), dtype=jnp.float32)

    out = jax.block_until_ready(pixelate(x, scale=4))

    ref = _pixelate_ref(np.asarray(x), scale=4)
    assert out.shape == (2, 4, 16, 16)
    np.testing.assert_allclose(np.asarray(out), ref, rtol=1e-6, atol=1e-6)

    print("KERNEL_OK")
</pallas_src>

<mosaic_0001>
module attributes {stable_mosaic.version = 11 : i64} {
  func.func @_pixelate_kernel(%arg0: i32, %arg1: memref<16x16xf32, #tpu.memory_space<vmem>>, %arg2: memref<128x128xf32, #tpu.memory_space<vmem>>, %arg3: memref<1x16x128xf32, #tpu.memory_space<vmem>>, %arg4: memref<1x16x128xf32, #tpu.memory_space<vmem>>) attributes {dimension_semantics = [#tpu.dimension_semantics<parallel>], iteration_bounds = array<i64: 1>, scalar_prefetch = 0 : i64, scratch_operands = 0 : i64, tpu.core_type = #tpu.core_type<tc>, window_params = [{pipeline_mode = #tpu.pipeline_mode<synchronous>, transform_indices = @transform_0, window_bounds = array<i64: 16, 16>}, {pipeline_mode = #tpu.pipeline_mode<synchronous>, transform_indices = @transform_1, window_bounds = array<i64: 128, 128>}, {transform_indices = @transform_2, window_bounds = array<i64: 1, 16, 128>}, {transform_indices = @transform_3, window_bounds = array<i64: 1, 16, 128>}]} {
    %c0 = arith.constant 0 : index
    %c0_0 = arith.constant 0 : index
    %c0_1 = arith.constant 0 : index
    %0 = vector.load %arg3[%c0, %c0_0, %c0_1] : memref<1x16x128xf32, #tpu.memory_space<vmem>>, vector<1x16x128xf32>
    %1 = vector.shape_cast %0 : vector<1x16x128xf32> to vector<16x128xf32>
    %c0_2 = arith.constant 0 : index
    %c0_3 = arith.constant 0 : index
    %2 = vector.load %arg2[%c0_2, %c0_3] : memref<128x128xf32, #tpu.memory_space<vmem>>, vector<128x128xf32>
    %cst = arith.constant dense<0.000000e+00> : vector<16x128xf32>
    %3 = tpu.matmul %1, %2, %cst {dimension_numbers = #tpu.dot_dimension_numbers<[1], [0], [0], [1], [0, 0, 1, 1], [], []>} : vector<16x128xf32>, vector<128x128xf32>, vector<16x128xf32> -> vector<16x128xf32>
    %c0_4 = arith.constant 0 : index
    %c0_5 = arith.constant 0 : index
    %4 = vector.load %arg1[%c0_4, %c0_5] : memref<16x16xf32, #tpu.memory_space<vmem>>, vector<16x16xf32>
    %5 = vector.shape_cast %4 : vector<16x16xf32> to vector<1x16x16xf32>
    %6 = vector.shape_cast %3 : vector<16x128xf32> to vector<1x16x128xf32>
    "tpu.trace_start"() <{level = 10 : i32, message = "phk,pkw->phw"}> : () -> ()
    %cst_6 = arith.constant dense<0.000000e+00> : vector<1x16x128xf32>
    %7 = tpu.matmul %5, %6, %cst_6 {dimension_numbers = #tpu.dot_dimension_numbers<[2], [1], [1], [2], [0, 0, 0, 1, 1, 2], [0], [0]>} : vector<1x16x16xf32>, vector<1x16x128xf32>, vector<1x16x128xf32> -> vector<1x16x128xf32>
    "tpu.trace_stop"() : () -> ()
    %c0_7 = arith.constant 0 : index
    %c0_8 = arith.constant 0 : index
    %c0_9 = arith.constant 0 : index
    %8 = vector.load %arg4[%c0_7, %c0_8, %c0_9] : memref<1x16x128xf32, #tpu.memory_space<vmem>>, vector<1x16x128xf32>
    tpu.vector_store %arg4[%c0_7, %c0_8, %c0_9], %7 {strides = array<i32>} : memref<1x16x128xf32, #tpu.memory_space<vmem>>, vector<1x16x128xf32>,
    return
  }
  func.func @transform_0(%arg0: i32) -> (i32, i32) {
    %c0_i32 = arith.constant 0 : i32
    %c0_i32_0 = arith.constant 0 : i32
    %c0_i32_1 = arith.constant 0 : i32
    return %c0_i32, %c0_i32_0 : i32, i32
  }
  func.func @transform_1(%arg0: i32) -> (i32, i32) {
    %c0_i32 = arith.constant 0 : i32
    %c0_i32_0 = arith.constant 0 : i32
    %c0_i32_1 = arith.constant 0 : i32
    return %c0_i32, %c0_i32_0 : i32, i32
  }
  func.func @transform_2(%arg0: i32) -> (i32, i32, i32) {
    %c0_i32 = arith.constant 0 : i32
    %c0_i32_0 = arith.constant 0 : i32
    %c0_i32_1 = arith.constant 0 : i32
    return %arg0, %c0_i32, %c0_i32_0 : i32, i32, i32
  }
  func.func @transform_3(%arg0: i32) -> (i32, i32, i32) {
    %c0_i32 = arith.constant 0 : i32
    %c0_i32_0 = arith.constant 0 : i32
    %c0_i32_1 = arith.constant 0 : i32
    return %arg0, %c0_i32, %c0_i32_0 : i32, i32, i32
  }
}

</mosaic_0001>

<bundles_post_ra>
// kernel: tpu_custom_call.1
= control target key start
LH: loop header
LB: loop body
LE: loop exit
PB: predicated region body
PF: predicated region fallthrough
CT: control target
= control target key end

     0   :  { %8 = vsyncpa [#allocation3], 0  ;;  %s548_s0 = inlined_call_operand.hbm [shape: f32[16,16], index: 0, kind: input, shape index: {}]   ;;  %s549_s1 = inlined_call_operand.hbm [shape: f32[128,128], index: 1, kind: input, shape index: {}]   ;;  %s550_s2 = inlined_call_operand.hbm [shape: f32[1,16,128], index: 2, kind: input, shape index: {}]   ;;  %s551_s3 = inlined_call_operand.hbm [shape: f32[1,16,128], index: 3, kind: output, shape index: {}]  }
   0x1   :  { %9 = vsyncpa [#allocation6], 0 }
   0x2   :  { %10 = vsyncpa [#allocation4], 0  ;;  %s455_s12 = smov [#allocation5]   ;;  %s456_s14 = smov [#allocation2]  }
   0x3   :  { %s28_s13 = sshll.u32 %s455_s12, 4  ;;  %s16_s15 = sshll.u32 %s456_s14, 4  ;;  %s29_s13 = int_to_ptr.vmem [resolvable:$true] %s28_s13  ;;  %s481_s15 = int_to_ptr.vmem [resolvable:$true] %s16_s15 }
   0x4   :  { %s361_s18 = scalar_lea.hbm %s549_s1, 2048 }
   0x5   :  { %p362_p0 = scmp.ne.s32.totalorder %s549_s1, %s361_s18  ;;  %p365_p1 = scmp.lt.u32.totalorder %s361_s18, %s549_s1 }
   0x7   :  { %p367_p2 = pnand %p365_p1, %p362_p0 }
   0x9   :  { %370 = shalt.err (!%p367_p2)
}
   0xa   :  { %s371_s23 = scalar_lea.vmem %s29_s13, 2048  ;;  %p376_p4 = scmp.lt.s32.totalorder %s29_s13, %s29_s13 }
   0xb   :  { %p372_p3 = scmp.ne.s32.totalorder %s29_s13, %s371_s23  ;;  %p377_p5 = scmp.lt.s32.totalorder %s371_s23, %s371_s23 }
   0xd   :  { %p378_p6 = por %p377_p5, %p376_p4 }
   0xf   :  { %p379_p7 = pnand %p378_p6, %p372_p3 }
  0x11   :  { %382 = shalt.err (!%p379_p7)
}
  0x12   :  { %s457_s24 = smov 128   ;;  %s458_s25 = smov 8  }
  0x13   :  { %34 = dma.hbm_to_vmem [thread:$0]  %s549_s1, 2048, %s29_s13, [#allocation6], %s457_s24, %s457_s24, %s458_s25  }
  0x14   :  { %s383_s30 = scalar_lea.hbm %s548_s0, 256 }
  0x15   :  { %p384_p8 = scmp.ne.s32.totalorder %s548_s0, %s383_s30  ;;  %p387_p9 = scmp.lt.u32.totalorder %s383_s30, %s548_s0 }
  0x17   :  { %p389_p10 = pnand %p387_p9, %p384_p8 }
  0x19   :  { %392 = shalt.err (!%p389_p10)
}
  0x1a   :  { %s393_s8 = scalar_lea.vmem %s481_s15, 256  ;;  %p398_p12 = scmp.lt.s32.totalorder %s481_s15, %s481_s15 }
  0x1b   :  { %p394_p11 = scmp.ne.s32.totalorder %s481_s15, %s393_s8  ;;  %p399_p13 = scmp.lt.s32.totalorder %s393_s8, %s393_s8 }
  0x1d   :  { %p400_p0 = por %p399_p13, %p398_p12 }
  0x1f   :  { %p401_p1 = pnand %p400_p0, %p394_p11 }
  0x21   :  { %404 = shalt.err (!%p401_p1)
}
  0x22   :  { %22 = dma.hbm_to_vmem [thread:$0]  %s548_s0, 256, %s481_s15, [#allocation3], %s457_s24, %s457_s24, %s458_s25  }
  0x23   :  { %s459_s10 = smov [#allocation7]   ;;  %s405_s14 = scalar_lea.hbm %s550_s2, 256 }
  0x24   :  { %s40_s11 = sshll.u32 %s459_s10, 4  ;;  %p406_p2 = scmp.ne.s32.totalorder %s550_s2, %s405_s14  ;;  %s41_s11 = int_to_ptr.vmem [resolvable:$true] %s40_s11 }
  0x25   :  { %p409_p3 = scmp.lt.u32.totalorder %s405_s14, %s550_s2 }
  0x27   :  { %p411_p4 = pnand %p409_p3, %p406_p2 }
  0x29   :  { %414 = shalt.err (!%p411_p4)
}
  0x2a   :  { %s415_s20 = scalar_lea.vmem %s41_s11, 256  ;;  %p420_p6 = scmp.lt.s32.totalorder %s41_s11, %s41_s11 }
  0x2b   :  { %p416_p5 = scmp.ne.s32.totalorder %s41_s11, %s415_s20  ;;  %p421_p7 = scmp.lt.s32.totalorder %s415_s20, %s415_s20 }
  0x2d   :  { %p422_p8 = por %p421_p7, %p420_p6 }
  0x2f   :  { %p423_p9 = pnand %p422_p8, %p416_p5 }
  0x31   :  { %426 = shalt.err (!%p423_p9)
}
  0x32   :  { %46 = dma.hbm_to_vmem [thread:$0]  %s550_s2, 256, %s41_s11, [#allocation6], %s457_s24, %s457_s24, %s458_s25  }
  0x33   :  { %449 = dma.done.wait [#allocation3], 256  }
  0x34   :  { %450 = vsyncadd [#allocation3], 4294967040 }
  0x35   :  { %451 = dma.done.wait [#allocation6], 2304  }
  0x36   :  { %452 = vsyncadd [#allocation6], 4294964992  ;;  %v58_v0 = vld [vmem:[#allocation5] sm:$0xff]  ;;  %v59_v1 = vld [vmem:[#allocation5 + $0x8] sm:$0xff]  ;;  %vm151_vm0 = vcmask 130048   ;;  %s460_s2 = smov [#allocation8]  }
  0x37   :  { %v60_v2 = vld [vmem:[#allocation5 + $0x10] sm:$0xff]  ;;  %v319_v3 = vpack.c.bf16 %v59_v1, %v58_v0  ;;  %v61_v4 = vld [vmem:[#allocation5 + $0x18] sm:$0xff]  ;;  %v62_v6 = vld [vmem:[#allocation5 + $0x20] sm:$0xff]  ;;  %s240_s21 = sshll.u32 %s460_s2, 4  ;;  %s241_s21 = int_to_ptr.vmem [resolvable:$true] %s240_s21 }
  0x38   :  { %v323_v5 = vpack.c.bf16 %v61_v4, %v60_v2  ;;  %v63_v7 = vld [vmem:[#allocation5 + $0x28] sm:$0xff]  ;;  %v56_v9 = vld [vmem:[#allocation7] sm:$0xff]  ;;  %v64_v10 = vld [vmem:[#allocation5 + $0x30] sm:$0xff]  ;;  %s427_s22 = scalar_lea.vmem %s241_s21, 256  ;;  %p432_p11 = scmp.lt.s32.totalorder %s241_s21, %s241_s21 }
  0x39   :  { %320 = vmatprep.subr.bf16.mxu0 %v319_v3  ;;  %v327_v8 = vpack.c.bf16 %v63_v7, %v62_v6  ;;  %v65_v11 = vld [vmem:[#allocation5 + $0x38] sm:$0xff]  ;;  %309 = vmatprep.mubr.f32.mxu0 %v56_v9  ;;  %v66_v13 = vld [vmem:[#allocation5 + $0x40] sm:$0xff]  ;;  %v67_v14 = vld [vmem:[#allocation5 + $0x48] sm:$0xff]  ;;  %p428_p10 = scmp.ne.s32.totalorder %s241_s21, %s427_s22  ;;  %p433_p12 = scmp.lt.s32.totalorder %s427_s22, %s427_s22 }
  0x3a   :  { %322 = vmatpush3.bf16.msra.mxu0 %v319_v3  ;;  %v331_v12 = vpack.c.bf16 %v65_v11, %v64_v10  ;;  %v335_v15 = vpack.c.bf16 %v67_v14, %v66_v13  ;;  %v68_v16 = vld [vmem:[#allocation5 + $0x50] sm:$0xff]  ;;  %v69_v17 = vld [vmem:[#allocation5 + $0x58] sm:$0xff]  ;;  %v70_v19 = vld [vmem:[#allocation5 + $0x60] sm:$0xff] }
  0x3b   :  { %324 = vmatprep.subr.bf16.mxu0 %v323_v5  ;;  %v339_v18 = vpack.c.bf16 %v69_v17, %v68_v16  ;;  %v71_v20 = vld [vmem:[#allocation5 + $0x68] sm:$0xff]  ;;  %v72_v22 = vld [vmem:[#allocation5 + $0x70] sm:$0xff]  ;;  %v73_v23 = vld [vmem:[#allocation5 + $0x78] sm:$0xff]  ;;  %p434_p13 = por %p433_p12, %p432_p11 }
  0x3c   :  { %v343_v21 = vpack.c.bf16 %v71_v20, %v70_v19  ;;  %v347_v24 = vpack.c.bf16 %v73_v23, %v72_v22  ;;  %v57_v25 = vld [vmem:[#allocation7 + $0x8] sm:$0xff]  ;;  %v149_v26 = vld [vmem:[#allocation2] sm:$0xff]  ;;  %v150_v30 = vld [vmem:[#allocation2 + $0x8] sm:$0xff] }
  0x3d   :  { %316 = vmatprep.mubr.msk.f32.mxu1 %vm151_vm0, %v149_v26  ;;  %p435_p0 = pnand %p434_p13, %p428_p10 }
  0x3e   :  { %326 = vmatpush3.bf16.msra.mxu0 %v323_v5 }
  0x3f   :  { %328 = vmatprep.subr.bf16.mxu0 %v327_v8 }
  0x42   :  { %330 = vmatpush3.bf16.msra.mxu0 %v327_v8 }
  0x43   :  { %332 = vmatprep.subr.bf16.mxu0 %v331_v12 }
  0x46   :  { %334 = vmatpush3.bf16.msra.mxu0 %v331_v12 }
  0x47   :  { %336 = vmatprep.subr.bf16.mxu0 %v335_v15 }
  0x4a   :  { %338 = vmatpush3.bf16.msra.mxu0 %v335_v15 }
  0x4b   :  { %340 = vmatprep.subr.bf16.mxu0 %v339_v18 }
  0x4e   :  { %342 = vmatpush3.bf16.msra.mxu0 %v339_v18 }
  0x4f   :  { %344 = vmatprep.subr.bf16.mxu0 %v343_v21 }
  0x52   :  { %346 = vmatpush3.bf16.msra.mxu0 %v343_v21 }
  0x53   :  { %348 = vmatprep.subr.bf16.mxu0 %v347_v24 }
  0x56   :  { %350 = vmatpush3.bf16.msra.mxu0 %v347_v24 }
  0x59   :  { %310 = vmatmul.mubr.f32.vlgmr.msra.gmra.mrb[0].mxu0 %v57_v25 }
 0x12c   :  { %v311_v27 = vpop.f32.mrb[0].mxu0 }
 0x12d   :  { %v140_v28 = vpop.f32.mrb[1].mxu0 }
 0x12e   :  { %v351_v29 = vpack.c.bf16 %v311_v27, %v140_v28 }
 0x130   :  { %352 = vmatprep.subr.bf16.mxu1 %v351_v29 }
 0x131   :  { %354 = vmatpush3.bf16.msra.mxu1 %v351_v29 }
 0x134   :  { %317 = vmatmul.mubr.msk.f32.vlgmr.msra.gmra.mrb[0].mxu1 %vm151_vm0, %v150_v30 }
 0x207   :  { %v318_v31 = vpop.f32.mrb[0].mxu1 }
 0x208   :  { %234 = vst [vmem:[#allocation8 + $0x8] sm:$0xff] %v318_v31  ;;  %v224_v32 = vpop.f32.mrb[1].mxu1 }
 0x209   :  { %233 = vst [vmem:[#allocation8] sm:$0xff] %v224_v32 }
 0x20a   :  { %438 = shalt.err (!%p435_p0)
}
 0x20b   :  { %s439_s27 = scalar_lea.hbm %s551_s3, 256 }
 0x20c   :  { %p440_p1 = scmp.ne.s32.totalorder %s551_s3, %s439_s27  ;;  %p443_p2 = scmp.lt.u32.totalorder %s439_s27, %s551_s3 }
 0x20e   :  { %p445_p3 = pnand %p443_p2, %p440_p1 }
 0x210   :  { %448 = shalt.err (!%p445_p3)
}
 0x211   :  { %246 = dma.vmem_to_hbm [thread:$0]  %s241_s21, 256, %s551_s3, [#allocation4], %s457_s24, %s457_s24, %s458_s25  }
 0x212   :  { %453 = dma.done.wait [#allocation4], 256  }
 0x213   :  { %454 = vsyncadd [#allocation4], 4294967040 }
 0x214   :  { %250 = vsyncpa [#allocation3], 1 }
 0x215   :  { %251 = vsyncpa [#allocation6], 1 }
 0x216   :  { %252 = vsyncpa [#allocation4], 1 }

</bundles_post_ra>
